<compile_context>
chip_gen: v7x
topology: tpu7x:2x2x1
jax: 0.10.0
libtpu: 0.0.40
codegen_flags: <defaults>
</compile_context>

<pallas_src>
import jax
import jax.numpy as jnp
from jax.experimental import pallas as pl
from jax.experimental.pallas import tpu as pltpu


def _weighted_avg_kernel(w_ref, x1_ref, x2_ref, o_ref):
    # w_ref: (2,) f32 scalars in SMEM (scalar prefetch).
    w0 = w_ref[0]
    w1 = w_ref[1]
    o_ref[...] = (w0 * x1_ref[...] + w1 * x2_ref[...]).astype(o_ref.dtype)


def _round_up(x, m):
    return ((x + m - 1) // m) * m


def _choose_lane(n):
    """Largest lane width in {1024, 512, 256, 128} dividing n (pad-free reshape)."""
    for lane in (1024, 512, 256, 128):
        if n % lane == 0:
            return lane, False
    return 128, True  # pathological n: fall back to a tiny pad up to 128


def _target_tile_bytes():
    """Per-operand target tile size by TPU generation (conservative if unknown)."""
    kind = ""
    try:
        kind = jax.devices()[0].device_kind.lower()
    except Exception:
        pass
    if ("v6" in kind) or ("v7" in kind) or ("7x" in kind):
        return 4 << 20  # 24 MiB in flight: fits v6e 32 MiB default / v7x 48 MiB cap
    return 2 << 20      # v5e: 16 MiB default scoped VMEM -> 12 MiB in flight


def linear_weighted_avg(weights, input1, input2):
    """weights: (2,) scalars; input1/input2: same-shape arrays (e.g. NCHW)."""
    assert input1.shape == input2.shape
    assert input1.dtype == input2.dtype
    orig_shape = input1.shape
    dtype = input1.dtype
    n = input1.size
    itemsize = jnp.dtype(dtype).itemsize
    sublane = {4: 8, 2: 16, 1: 32}.get(itemsize, 8)  # dtype-native sublane tile

    lane, needs_pad = _choose_lane(n)
    x1 = input1.reshape(-1)
    x2 = input2.reshape(-1)
    if needs_pad:
        # TODO(synk): handle the <128-element remainder with a separate tiny op
        # instead of a whole-array pad (only hit when n is not a multiple of 128).
        n_pad = _round_up(n, lane)
        x1 = jnp.pad(x1, (0, n_pad - n))
        x2 = jnp.pad(x2, (0, n_pad - n))
    else:
        n_pad = n
    rows = n_pad // lane
    x1 = x1.reshape(rows, lane)
    x2 = x2.reshape(rows, lane)

    total_bytes = n_pad * itemsize
    if rows <= sublane or total_bytes <= (1 << 20):
        # Tiny input: one full-slab block (block_shape == array shape is legal).
        block_rows = rows
    else:
        tile_bytes = _target_tile_bytes()
        target_rows = max(sublane, tile_bytes // (itemsize * lane))
        block_rows = min(_round_up(target_rows, sublane), _round_up(rows, sublane))
        # Guarantee >=2 grid steps above ~1 MiB (>=4 above ~4 MiB) so v7x's two
        # TensorCores both get work under the "parallel" grid axis.
        min_steps = 4 if total_bytes > (4 << 20) else 2
        block_rows = min(block_rows, _round_up(pl.cdiv(rows, min_steps), sublane))
        # Prefer an even (balanced) step count when the grid is small.
        steps = pl.cdiv(rows, block_rows)
        if 1 < steps < 8 and steps % 2 == 1:
            cand = _round_up(pl.cdiv(rows, steps + 1), sublane)
            if pl.cdiv(rows, cand) % 2 == 0:
                block_rows = cand
    block_rows = max(int(block_rows), 1)

    grid = (pl.cdiv(rows, block_rows),)
    blk = pl.BlockSpec((block_rows, lane), lambda i, w: (i, 0))

    block_bytes = block_rows * lane * itemsize
    vmem_limit = min(3 * 2 * block_bytes + (8 << 20), 48 << 20)

    out = pl.pallas_call(
        _weighted_avg_kernel,
        out_shape=jax.ShapeDtypeStruct((rows, lane), dtype),
        grid_spec=pltpu.PrefetchScalarGridSpec(
            num_scalar_prefetch=1,
            grid=grid,
            in_specs=[blk, blk],
            out_specs=pl.BlockSpec((block_rows, lane), lambda i, w: (i, 0)),
        ),
        compiler_params=pltpu.CompilerParams(
            dimension_semantics=("parallel",),
            vmem_limit_bytes=vmem_limit,
        ),
        cost_estimate=pl.CostEstimate(
            flops=3 * n, transcendentals=0, bytes_accessed=3 * n * itemsize
        ),
    )(weights.astype(jnp.float32), x1, x2)

    out = out.reshape(-1)
    if needs_pad:
        out = out[:n]
    return out.reshape(orig_shape)


if __name__ == "__main__":
    key = jax.random.PRNGKey(0)
    k_w, k_a, k_b, k_c, k_d, k_e, k_f = jax.random.split(key, 7)

    # Two learnable scalar weights (n_inputs = 2), deterministically initialized.
    weights = jax.random.normal(k_w, (2,), dtype=jnp.float32)

    # Small NCHW inputs (tiny single-block path, lane=1024, grid=(1,)).
    input1 = jax.random.normal(k_a, (2, 4, 16, 16), dtype=jnp.float32)
    input2 = jax.random.normal(k_b, (2, 4, 16, 16), dtype=jnp.float32)
    out = jax.block_until_ready(linear_weighted_avg(weights, input1, input2))
    ref = weights[0] * input1 + weights[1] * input2
    assert out.shape == input1.shape
    assert jnp.allclose(out, ref, atol=1e-6, rtol=1e-6)

    # Larger input: multi-step even "parallel" grid (both v7x TCs stream).
    big1 = jax.random.normal(k_c, (8, 16, 64, 128), dtype=jnp.float32)
    big2 = jax.random.normal(k_d, (8, 16, 64, 128), dtype=jnp.float32)
    out_big = jax.block_until_ready(linear_weighted_avg(weights, big1, big2))
    ref_big = weights[0] * big1 + weights[1] * big2
    assert jnp.allclose(out_big, ref_big, atol=1e-6, rtol=1e-6)

    # Non-1024-divisible shape: exercises lane=512 selection and the masked
    # partial trailing block — no jnp.pad and no output slice.
    odd1 = jax.random.normal(k_e, (25, 16, 32, 33), dtype=jnp.float32)
    odd2 = jax.random.normal(k_f, (25, 16, 32, 33), dtype=jnp.float32)
    out_odd = jax.block_until_ready(linear_weighted_avg(weights, odd1, odd2))
    ref_odd = weights[0] * odd1 + weights[1] * odd2
    assert jnp.allclose(out_odd, ref_odd, atol=1e-6, rtol=1e-6)

    print("KERNEL_OK")
</pallas_src>

<mosaic_0001>
module attributes {stable_mosaic.version = 11 : i64} {
  func.func @_weighted_avg_kernel(%arg0: i32, %arg1: memref<2xf32, #tpu.memory_space<smem>>, %arg2: memref<2x1024xf32, #tpu.memory_space<vmem>>, %arg3: memref<2x1024xf32, #tpu.memory_space<vmem>>, %arg4: memref<2x1024xf32, #tpu.memory_space<vmem>>) attributes {dimension_semantics = [#tpu.dimension_semantics<parallel>], iteration_bounds = array<i64: 1>, scalar_prefetch = 1 : i64, scratch_operands = 0 : i64, tpu.core_type = #tpu.core_type<tc>, window_params = [{transform_indices = @transform_0, window_bounds = array<i64: 2, 1024>}, {transform_indices = @transform_1, window_bounds = array<i64: 2, 1024>}, {transform_indices = @transform_2, window_bounds = array<i64: 2, 1024>}]} {
    %c0 = arith.constant 0 : index
    %0 = memref.load %arg1[%c0] : memref<2xf32, #tpu.memory_space<smem>>
    %c1 = arith.constant 1 : index
    %1 = memref.load %arg1[%c1] : memref<2xf32, #tpu.memory_space<smem>>
    %c0_0 = arith.constant 0 : index
    %c0_1 = arith.constant 0 : index
    %2 = vector.load %arg2[%c0_0, %c0_1] : memref<2x1024xf32, #tpu.memory_space<vmem>>, vector<2x1024xf32>
    %3 = vector.broadcast %0 : f32 to vector<2x1024xf32>
    %4 = arith.mulf %3, %2 : vector<2x1024xf32>
    %c0_2 = arith.constant 0 : index
    %c0_3 = arith.constant 0 : index
    %5 = vector.load %arg3[%c0_2, %c0_3] : memref<2x1024xf32, #tpu.memory_space<vmem>>, vector<2x1024xf32>
    %6 = vector.broadcast %1 : f32 to vector<2x1024xf32>
    %7 = arith.mulf %6, %5 : vector<2x1024xf32>
    %8 = arith.addf %4, %7 : vector<2x1024xf32>
    %c0_4 = arith.constant 0 : index
    %c0_5 = arith.constant 0 : index
    %9 = vector.load %arg4[%c0_4, %c0_5] : memref<2x1024xf32, #tpu.memory_space<vmem>>, vector<2x1024xf32>
    tpu.vector_store %arg4[%c0_4, %c0_5], %8 {strides = array<i32>} : memref<2x1024xf32, #tpu.memory_space<vmem>>, vector<2x1024xf32>,
    return
  }
  func.func @transform_0(%arg0: i32, %arg1: memref<2xf32, #tpu.memory_space<smem>>) -> (i32, i32) {
    %c0_i32 = arith.constant 0 : i32
    %c0_i32_0 = arith.constant 0 : i32
    return %arg0, %c0_i32 : i32, i32
  }
  func.func @transform_1(%arg0: i32, %arg1: memref<2xf32, #tpu.memory_space<smem>>) -> (i32, i32) {
    %c0_i32 = arith.constant 0 : i32
    %c0_i32_0 = arith.constant 0 : i32
    return %arg0, %c0_i32 : i32, i32
  }
  func.func @transform_2(%arg0: i32, %arg1: memref<2xf32, #tpu.memory_space<smem>>) -> (i32, i32) {
    %c0_i32 = arith.constant 0 : i32
    %c0_i32_0 = arith.constant 0 : i32
    return %arg0, %c0_i32 : i32, i32
  }
}

</mosaic_0001>

<bundles_post_ra>
// kernel: tpu_custom_call.1
= control target key start
LH: loop header
LB: loop body
LE: loop exit
PB: predicated region body
PF: predicated region fallthrough
CT: control target
= control target key end

     0   :  { %s234_s0 = inlined_call_operand.hbm [shape: f32[2], index: 0, kind: input, shape index: {}]   ;;  %s235_s1 = inlined_call_operand.hbm [shape: f32[2,1024], index: 1, kind: input, shape index: {}]   ;;  %s236_s2 = inlined_call_operand.hbm [shape: f32[2,1024], index: 2, kind: input, shape index: {}]   ;;  %s237_s3 = inlined_call_operand.hbm [shape: f32[2,1024], index: 3, kind: output, shape index: {}]  }
   0x1   :  { %s78_s14 = scalar_lea.hbm %s234_s0, 16 }
   0x2   :  { %p79_p0 = scmp.ne.s32.totalorder %s234_s0, %s78_s14  ;;  %p82_p1 = scmp.lt.u32.totalorder %s78_s14, %s234_s0 }
   0x4   :  { %p84_p2 = pnand %p82_p1, %p79_p0 }
   0x6   :  { %87 = shalt.err (!%p84_p2)  }
   0x7   :  { %s162_s19 = smov [#allocation3]  }
   0x8   :  { %9 = dma.hbm_to_smem %s234_s0, 16, %s162_s19, [#allocation2] }
   0x9   :  { %154 = dma.done.wait [#allocation2], 16 }
   0xa   :  { %155 = vsyncadd [#allocation2], 4294967280 }
   0xb   :  { %11 = sfence }
   0xc   :  { %12 = vsyncpa [#allocation5], 0 }
   0xd   :  { %13 = vsyncpa [#allocation8], 0 }
   0xe   :  { %14 = vsyncpa [#allocation6], 0  ;;  %s163_s22 = smov [#allocation4]   ;;  %s164_s24 = smov [#allocation7]  }
   0xf   :  { %s21_s23 = sshll.u32 %s163_s22, 4  ;;  %s31_s25 = sshll.u32 %s164_s24, 4  ;;  %s22_s23 = int_to_ptr.vmem [resolvable:$true] %s21_s23  ;;  %s32_s25 = int_to_ptr.vmem [resolvable:$true] %s31_s25 }
  0x10   :  { %s88_s28 = scalar_lea.hbm %s235_s1, 256 }
  0x11   :  { %p89_p3 = scmp.ne.s32.totalorder %s235_s1, %s88_s28  ;;  %p92_p4 = scmp.lt.u32.totalorder %s88_s28, %s235_s1 }
  0x13   :  { %p94_p5 = pnand %p92_p4, %p89_p3 }
  0x15   :  { %97 = shalt.err (!%p94_p5)
}
  0x16   :  { %s98_s5 = scalar_lea.vmem %s22_s23, 256  ;;  %p103_p7 = scmp.lt.s32.totalorder %s22_s23, %s22_s23 }
  0x17   :  { %p99_p6 = scmp.ne.s32.totalorder %s22_s23, %s98_s5  ;;  %p104_p8 = scmp.lt.s32.totalorder %s98_s5, %s98_s5 }
  0x19   :  { %p105_p9 = por %p104_p8, %p103_p7 }
  0x1b   :  { %p106_p10 = pnand %p105_p9, %p99_p6 }
  0x1d   :  { %109 = shalt.err (!%p106_p10)
}
  0x1e   :  { %24 = dma.hbm_to_vmem [thread:$0]  %s235_s1, 256, %s22_s23, [#allocation5]  }
  0x1f   :  { %s110_s10 = scalar_lea.hbm %s236_s2, 256 }
  0x20   :  { %p111_p11 = scmp.ne.s32.totalorder %s236_s2, %s110_s10  ;;  %p114_p12 = scmp.lt.u32.totalorder %s110_s10, %s236_s2 }
  0x22   :  { %p116_p13 = pnand %p114_p12, %p111_p11 }
  0x24   :  { %119 = shalt.err (!%p116_p13)
}
  0x25   :  { %s120_s15 = scalar_lea.vmem %s32_s25, 256  ;;  %p125_p1 = scmp.lt.s32.totalorder %s32_s25, %s32_s25 }
  0x26   :  { %p121_p0 = scmp.ne.s32.totalorder %s32_s25, %s120_s15  ;;  %p126_p2 = scmp.lt.s32.totalorder %s120_s15, %s120_s15 }
  0x28   :  { %p127_p3 = por %p126_p2, %p125_p1 }
  0x2a   :  { %p128_p4 = pnand %p127_p3, %p121_p0 }
  0x2c   :  { %131 = shalt.err (!%p128_p4)
}
  0x2d   :  { %34 = dma.hbm_to_vmem [thread:$0]  %s236_s2, 256, %s32_s25, [#allocation8]  }
  0x2e   :  { %156 = dma.done.wait [#allocation5], 256  }
  0x2f   :  { %157 = vsyncadd [#allocation5], 4294967040 }
  0x30   :  { %158 = dma.done.wait [#allocation8], 256  }
  0x31   :  { %159 = vsyncadd [#allocation8], 4294967040  ;;  %s41_s17 = sld [smem:[#allocation3]]  ;;  %s73_s18 = sld [smem:[#allocation3 + $0x1]]  ;;  %v43_v0 = vld [vmem:[#allocation4] sm:$0xff]  ;;  %v48_v2 = vld [vmem:[#allocation7] sm:$0xff] }
  0x32   :  { %v44_v4 = vld [vmem:[#allocation4 + $0x8] sm:$0xff]  ;;  %v49_v8 = vld [vmem:[#allocation7 + $0x8] sm:$0xff]  ;;  %s165_s19 = smov [#allocation9]  }
  0x33   :  { %s63_s20 = sshll.u32 %s165_s19, 4  ;;  %s64_s20 = int_to_ptr.vmem [resolvable:$true] %s63_s20 }
  0x34   :  { %s132_s2 = scalar_lea.vmem %s64_s20, 256  ;;  %p137_p6 = scmp.lt.s32.totalorder %s64_s20, %s64_s20 }
  0x35   :  { %p133_p5 = scmp.ne.s32.totalorder %s64_s20, %s132_s2  ;;  %p138_p7 = scmp.lt.s32.totalorder %s132_s2, %s132_s2 }
  0x37   :  { %v45_v1 = vstv %s41_s17  ;;  %v50_v3 = vstv %s73_s18  ;;  %p139_p8 = por %p138_p7, %p137_p6 }
  0x38   :  { %v46_v5 = vmul.f32 %v45_v1, %v43_v0  ;;  %v51_v6 = vmul.f32 %v50_v3, %v48_v2  ;;  %v47_v7 = vmul.f32 %v45_v1, %v44_v4  ;;  %v52_v9 = vmul.f32 %v50_v3, %v49_v8 }
  0x39   :  { %p140_p9 = pnand %p139_p8, %p133_p5 }
  0x3a   :  { %v53_v10 = vadd.f32 %v51_v6, %v46_v5  ;;  %v54_v11 = vadd.f32 %v52_v9, %v47_v7 }
  0x3c   :  { %55 = vst [vmem:[#allocation9] sm:$0xff] %v53_v10  ;;  %56 = vst [vmem:[#allocation9 + $0x8] sm:$0xff] %v54_v11 }
  0x3d   :  { %143 = shalt.err (!%p140_p9)
}
  0x3e   :  { %s144_s23 = scalar_lea.hbm %s237_s3, 256 }
  0x3f   :  { %p145_p10 = scmp.ne.s32.totalorder %s237_s3, %s144_s23  ;;  %p148_p11 = scmp.lt.u32.totalorder %s144_s23, %s237_s3 }
  0x41   :  { %p150_p12 = pnand %p148_p11, %p145_p10 }
  0x43   :  { %153 = shalt.err (!%p150_p12)
}
  0x44   :  { %66 = dma.vmem_to_hbm [thread:$0]  %s64_s20, 256, %s237_s3, [#allocation6]  }
  0x45   :  { %160 = dma.done.wait [#allocation6], 256  }
  0x46   :  { %161 = vsyncadd [#allocation6], 4294967040 }
  0x47   :  { %70 = vsyncpa [#allocation5], 1 }
  0x48   :  { %71 = vsyncpa [#allocation8], 1 }
  0x49   :  { %72 = vsyncpa [#allocation6], 1 }

</bundles_post_ra>
